<compile_context>
chip_gen: v7x
topology: tpu7x:2x2x1
jax: 0.10.0
libtpu: 0.0.40
codegen_flags: <defaults>
</compile_context>

<pallas_src>
import numpy as np
import jax
import jax.numpy as jnp
from jax import lax
from jax.experimental import pallas as pl
from jax.experimental.pallas import tpu as pltpu


# ---------------------------------------------------------------------------
# Setup-time helpers (mirror xcal setup code; NOT the forward hot path)
# ---------------------------------------------------------------------------
def first_nonzero_from_right(arr):
    rev = arr[::-1]
    rev_index = int(np.argmax(rev != 0))
    if rev[rev_index] == 0:
        return -1
    return len(arr) - 1 - rev_index


def prepare_for_interpolation(src_spec_list):
    m = src_spec_list.copy()
    kv_index = [first_nonzero_from_right(m[i]) for i in range(len(m))]
    for sid in range(len(m) - 1):
        v0 = kv_index[sid]
        v1 = kv_index[sid + 1]
        f1 = m[sid + 1]
        for v in range(v0, v1):
            if v == v1:
                m[sid][v] = 0.0
            else:
                r = (v - float(v0)) / (v1 - float(v0))
                m[sid][v] = -r / (1.0 - r) * f1[v]
    return m


def normalize_tuple(t):
    init, lo, hi = t
    if lo is None:
        lo = init
    if hi is None:
        hi = init
    if lo == hi:
        return 1.0, lo, hi
    return (init - lo) / (hi - lo), lo, hi


def denormalize_and_clamp(norm, lo, hi):
    # get_params(): denormalize then clamp_with_grad to [lo, hi]
    if lo == hi:
        return float(norm * lo)
    return float(np.clip(norm * (hi - lo) + lo, lo, hi))


def _round_up(n, m):
    return ((n + m - 1) // m) * m


def _build_interp1d_weights(table_energies, query_energies):
    """Host-side hoist of the Interp1D stage: sparse (NQ, NT) weight matrix.

    Valid because table_energies and query_energies are constants of the
    forward call (they never depend on the learned voltage/angle parameters).
    """
    te = np.asarray(table_energies, np.float64)
    q = np.asarray(query_energies, np.float64)
    NT, NQ = te.shape[0], q.shape[0]
    # torch.searchsorted default (right=False) == numpy side='left'
    idx = np.clip(np.searchsorted(te, q, side='left'), 1, NT - 1)
    x0 = te[idx - 1]
    x1 = te[idx]
    alpha = (q - x0) / (x1 - x0)
    W = np.zeros((NQ, NT), np.float32)
    rows = np.arange(NQ)
    W[rows, idx - 1] = (1.0 - alpha).astype(np.float32)
    W[rows, idx] = alpha.astype(np.float32)
    return W


def _build_interp2d_weights(voltages, takeoff_angles, volts_eval, angs_eval):
    """Host-side hoist of the Interp2D stage: sparse (B, NV*NA) bilinear
    weight matrix (4 nonzeros per row, with 1/denom folded in).

    Valid because voltage / takeoff_angle are concrete host scalars after
    get_params() denormalization+clamp, so the searchsorted indices and
    bilinear weights are static w.r.t. the kernel.
    """
    NV, NA = len(voltages), len(takeoff_angles)
    B = len(volts_eval)
    W = np.zeros((B, NV * NA), np.float32)
    for b in range(B):
        v = float(volts_eval[b])
        t = float(angs_eval[b])
        vi = int(np.searchsorted(voltages, v, side='left')) - 1
        ti = int(np.searchsorted(takeoff_angles, t, side='left')) - 1
        # Upstream Interp2D quirk reproduced exactly: the voltage index is
        # clamped with x.size(1)-2 == NA-2, the angle index with y.size(0)-2
        # == NV-2.  If that leaves an out-of-range index (only possible when
        # NV != NA), the torch reference would raise IndexError on the gather;
        # we raise the same here instead of silently clamping.
        vi = int(np.clip(vi, 0, NA - 2))
        ti = int(np.clip(ti, 0, NV - 2))
        if not (0 <= vi <= NV - 2) or not (0 <= ti <= NA - 2):
            raise IndexError(
                'Interp2D index out of range (NV != NA clamp quirk in the reference).')
        x0, x1 = float(voltages[vi]), float(voltages[vi + 1])
        y0, y1 = float(takeoff_angles[ti]), float(takeoff_angles[ti + 1])
        inv = 1.0 / ((x1 - x0) * (y1 - y0))
        W[b, vi * NA + ti] = (x1 - v) * (y1 - t) * inv
        W[b, vi * NA + ti + 1] = (x1 - v) * (t - y0) * inv
        W[b, (vi + 1) * NA + ti] = (v - x0) * (y1 - t) * inv
        W[b, (vi + 1) * NA + ti + 1] = (v - x0) * (t - y0) * inv
    return W


# ---------------------------------------------------------------------------
# Pallas kernel: two streaming MXU matmuls + relu
# ---------------------------------------------------------------------------
def _kernel(wb_ref, z_ref, wt_ref, out_ref):
    # Stage 1 (Interp2D): bilinear weights x spectra table -> per-eval spectra.
    src = jnp.dot(wb_ref[...], z_ref[...],
                  preferred_element_type=jnp.float32,
                  precision=lax.Precision.HIGHEST)          # (TILE_B, NT_pad)
    src = jnp.maximum(src, 0.0)                              # Interp2D clamp(min=0)
    # Stage 2 (Interp1D): spectra x energy-interp weights -> query responses.
    res = jnp.dot(src, wt_ref[...],
                  preferred_element_type=jnp.float32,
                  precision=lax.Precision.HIGHEST)           # (TILE_B, TILE_NQ)
    out_ref[...] = jnp.maximum(res, 0.0)                     # Interp1D clamp(min=0)


# ---------------------------------------------------------------------------
# Wrappers
# ---------------------------------------------------------------------------
def reflection_source_forward_batched(query_energies, voltages_eval, takeoff_angles_eval,
                                      voltages, takeoff_angles, table_energies, z_mod,
                                      *, tile_b=256, tile_nq=512):
    """Batched Pallas implementation of Reflection_Source.forward (Interp2D case).

    Evaluates B (voltage, takeoff_angle) pairs against the same spectra table
    and the same query energies in one pallas_call.  Each grid step processes
    a TILE_B x TILE_NQ output tile via two MXU matmuls; the spectra table and
    the Interp1D weights are VMEM-resident across batch-tile steps.
    """
    voltages = np.asarray(voltages, np.float32)
    takeoff_angles = np.asarray(takeoff_angles, np.float32)
    table_energies = np.asarray(table_energies, np.float32)
    query_energies = np.asarray(query_energies, np.float32)
    voltages_eval = np.atleast_1d(np.asarray(voltages_eval, np.float32))
    takeoff_angles_eval = np.atleast_1d(np.asarray(takeoff_angles_eval, np.float32))

    NV, NA = int(voltages.shape[0]), int(takeoff_angles.shape[0])
    NT, NQ = int(table_energies.shape[0]), int(query_energies.shape[0])
    B = int(voltages_eval.shape[0])
    assert takeoff_angles_eval.shape[0] == B

    # Range checks mirroring Interp2D / Interp1D ValueError semantics (glue).
    if (np.any(voltages_eval < voltages.min()) or np.any(voltages_eval > voltages.max())
            or np.any(takeoff_angles_eval < takeoff_angles.min())
            or np.any(takeoff_angles_eval > takeoff_angles.max())):
        raise ValueError('The new_x or new_y values are outside the range of x or y.')
    if np.any(query_energies < table_energies.min()) or np.any(query_energies > table_energies.max()):
        raise ValueError('Some values in new_x are outside the range of x.')
    # Duplicate grid points would produce Inf/NaN (in torch too); reject early.
    if (np.any(np.diff(voltages) <= 0) or np.any(np.diff(takeoff_angles) <= 0)
            or np.any(np.diff(table_energies) <= 0)):
        raise ValueError('Grid coordinates must be strictly increasing.')

    # TODO(synk): degenerate branches of forward (Interp1D over only voltage or
    # only angle, and src_spec_interp_func=None) are not implemented; this
    # kernel covers the NV>1 & NA>1 Interp2D path.

    NG = NV * NA
    NG_pad = _round_up(NG, 8)                     # sublane-align the table rows
    NT_pad = max(128, _round_up(NT, 128))         # lane-align the energy bins
    NQ_pad = max(128, _round_up(NQ, 128))         # lane-align the query energies

    # Batch tile: >=8 sublanes, up to tile_b rows per MXU pass; multiple grid
    # steps (parallel axis) keep both v7x TensorCores busy for large B.
    TILE_B = min(int(tile_b), _round_up(B, 8))
    B_pad = _round_up(B, TILE_B)

    # Query tile: caps the resident Wt block so large NQ stays within VMEM
    # (relevant first on v7x's 64 MiB); at small NQ this is a single tile.
    TILE_NQ = min(int(tile_nq), NQ_pad)
    NQ_pad = _round_up(NQ_pad, TILE_NQ)

    # --- Host-hoisted weights ------------------------------------------------
    Wb = np.zeros((B_pad, NG_pad), np.float32)
    Wb[:B, :NG] = _build_interp2d_weights(voltages, takeoff_angles,
                                          voltages_eval, takeoff_angles_eval)

    W1 = _build_interp1d_weights(table_energies, query_energies)   # (NQ, NT)
    Wt = np.zeros((NT_pad, NQ_pad), np.float32)
    Wt[:NT, :NQ] = W1.T

    # Spectra table flattened to (NG_pad, NT_pad): rows = (voltage, angle) grid
    # points on the sublane axis, lanes = energy bins (zero-padded).
    z_pad = np.zeros((NG_pad, NT_pad), np.float32)
    z_pad[:NG, :NT] = np.asarray(z_mod, np.float32).reshape(NG, NT)

    grid = (B_pad // TILE_B, NQ_pad // TILE_NQ)

    out = pl.pallas_call(
        _kernel,
        grid=grid,
        out_shape=jax.ShapeDtypeStruct((B_pad, NQ_pad), jnp.float32),
        in_specs=[
            # Per-batch-tile bilinear weights.
            pl.BlockSpec((TILE_B, NG_pad), lambda i, j: (i, 0)),
            # Spectra table: constant index_map -> revisit-resident in VMEM.
            pl.BlockSpec((NG_pad, NT_pad), lambda i, j: (0, 0)),
            # Interp1D weights: resident across batch tiles, tiled over NQ.
            pl.BlockSpec((NT_pad, TILE_NQ), lambda i, j: (0, j)),
        ],
        out_specs=pl.BlockSpec((TILE_B, TILE_NQ), lambda i, j: (i, j)),
        compiler_params=pltpu.CompilerParams(
            dimension_semantics=("parallel", "parallel")),   # 2 TCs on v7x
    )(jnp.asarray(Wb), jnp.asarray(z_pad), jnp.asarray(Wt))

    return out[:B, :NQ]


def reflection_source_forward(query_energies, voltage, takeoff_angle,
                              voltages, takeoff_angles, table_energies, z_mod):
    """Single-evaluation forward (matches the module's forward signature)."""
    out = reflection_source_forward_batched(
        query_energies, [voltage], [takeoff_angle],
        voltages, takeoff_angles, table_energies, z_mod)
    return out[0]


# ---------------------------------------------------------------------------
# Pure-numpy reference of the torch forward (for verification)
# ---------------------------------------------------------------------------
def numpy_reference(query_energies, voltage, takeoff_angle,
                    voltages, takeoff_angles, table_energies, z_mod):
    NV, NA, NT = len(voltages), len(takeoff_angles), len(table_energies)
    vi = int(np.clip(np.searchsorted(voltages, voltage, side='left') - 1, 0, NA - 2))
    ti = int(np.clip(np.searchsorted(takeoff_angles, takeoff_angle, side='left') - 1,
                     0, NV - 2))
    x0, x1 = voltages[vi], voltages[vi + 1]
    y0, y1 = takeoff_angles[ti], takeoff_angles[ti + 1]
    z00, z01 = z_mod[vi, ti], z_mod[vi, ti + 1]
    z10, z11 = z_mod[vi + 1, ti], z_mod[vi + 1, ti + 1]
    w00 = (x1 - voltage) * (y1 - takeoff_angle)
    w01 = (x1 - voltage) * (takeoff_angle - y0)
    w10 = (voltage - x0) * (y1 - takeoff_angle)
    w11 = (voltage - x0) * (takeoff_angle - y0)
    src = (w00 * z00 + w01 * z01 + w10 * z10 + w11 * z11) / ((x1 - x0) * (y1 - y0))
    src = np.maximum(src, 0.0)
    idx = np.clip(np.searchsorted(table_energies, query_energies, side='left'), 1, NT - 1)
    ex0, ex1 = table_energies[idx - 1], table_energies[idx]
    fy0, fy1 = src[idx - 1], src[idx]
    alpha = (query_energies - ex0) / (ex1 - ex0)
    return np.maximum(fy0 + alpha * (fy1 - fy0), 0.0)


if __name__ == "__main__":
    NV, NA, NT, NQ = 5, 5, 64, 16

    voltages = np.array([20., 30., 40., 50., 60.], dtype=np.float32)       # kV
    takeoff_angles = np.array([5., 10., 15., 20., 25.], dtype=np.float32)  # deg
    table_energies = np.arange(1, NT + 1, dtype=np.float32)                # keV

    key = jax.random.PRNGKey(0)
    k_spec, k_q = jax.random.split(key)
    base = np.asarray(jax.random.uniform(k_spec, (NV, NA, NT),
                                         minval=0.5, maxval=1.5), dtype=np.float32)
    # Physically-motivated spectra: zero above the tube voltage (kVp cutoff).
    cutoff = (table_energies[None, None, :] <= voltages[:, None, None]).astype(np.float32)
    src_spec_list = base * cutoff

    # set_src_spec_list preprocessing: prepare_for_interpolation per angle column.
    modified = src_spec_list.copy()
    for tti in range(NA):
        modified[:, tti] = prepare_for_interpolation(modified[:, tti])

    query_energies = np.asarray(
        jax.random.uniform(k_q, (NQ,), minval=1.5, maxval=59.5), dtype=np.float32)

    # --- single evaluation (module forward: one voltage, one takeoff angle) ---
    voltage_norm, v_lo, v_hi = normalize_tuple((44.0, 20.0, 60.0))
    angle_norm, a_lo, a_hi = normalize_tuple((12.0, 5.0, 25.0))
    voltage = denormalize_and_clamp(voltage_norm, v_lo, v_hi)        # get_params()
    takeoff_angle = denormalize_and_clamp(angle_norm, a_lo, a_hi)

    out1 = reflection_source_forward(query_energies, voltage, takeoff_angle,
                                     voltages, takeoff_angles, table_energies, modified)
    out1 = jax.block_until_ready(out1)
    ref1 = numpy_reference(query_energies, voltage, takeoff_angle,
                           voltages, takeoff_angles, table_energies, modified)
    np.testing.assert_allclose(np.asarray(out1), ref1, rtol=1e-3, atol=1e-5)

    # --- batched evaluations: B (voltage, angle) pairs in one pallas_call ---
    v_tuples = [(44.0, 20.0, 60.0), (25.0, 20.0, 60.0), (57.5, 20.0, 60.0), (33.3, 20.0, 60.0)]
    a_tuples = [(12.0, 5.0, 25.0), (7.5, 5.0, 25.0), (22.0, 5.0, 25.0), (18.0, 5.0, 25.0)]
    v_batch, a_batch = [], []
    for tv, ta in zip(v_tuples, a_tuples):
        n, lo, hi = normalize_tuple(tv)
        v_batch.append(denormalize_and_clamp(n, lo, hi))
        n, lo, hi = normalize_tuple(ta)
        a_batch.append(denormalize_and_clamp(n, lo, hi))

    outB = reflection_source_forward_batched(query_energies, v_batch, a_batch,
                                             voltages, takeoff_angles, table_energies,
                                             modified)
    outB = jax.block_until_ready(outB)
    for bi in range(len(v_batch)):
        refb = numpy_reference(query_energies, v_batch[bi], a_batch[bi],
                               voltages, takeoff_angles, table_energies, modified)
        np.testing.assert_allclose(np.asarray(outB[bi]), refb, rtol=1e-3, atol=1e-5)

    print("KERNEL_OK")
</pallas_src>

<mosaic_0001>
module attributes {stable_mosaic.version = 11 : i64} {
  func.func @_kernel(%arg0: i32, %arg1: i32, %arg2: memref<8x32xf32, #tpu.memory_space<vmem>>, %arg3: memref<32x128xf32, #tpu.memory_space<vmem>>, %arg4: memref<128x128xf32, #tpu.memory_space<vmem>>, %arg5: memref<8x128xf32, #tpu.memory_space<vmem>>) attributes {dimension_semantics = [#tpu.dimension_semantics<parallel>, #tpu.dimension_semantics<parallel>], iteration_bounds = array<i64: 1, 1>, scalar_prefetch = 0 : i64, scratch_operands = 0 : i64, tpu.core_type = #tpu.core_type<tc>, window_params = [{transform_indices = @transform_0, window_bounds = array<i64: 8, 32>}, {pipeline_mode = #tpu.pipeline_mode<synchronous>, transform_indices = @transform_1, window_bounds = array<i64: 32, 128>}, {transform_indices = @transform_2, window_bounds = array<i64: 128, 128>}, {transform_indices = @transform_3, window_bounds = array<i64: 8, 128>}]} {
    %c0 = arith.constant 0 : index
    %c0_0 = arith.constant 0 : index
    %0 = vector.load %arg2[%c0, %c0_0] : memref<8x32xf32, #tpu.memory_space<vmem>>, vector<8x32xf32>
    %c0_1 = arith.constant 0 : index
    %c0_2 = arith.constant 0 : index
    %1 = vector.load %arg3[%c0_1, %c0_2] : memref<32x128xf32, #tpu.memory_space<vmem>>, vector<32x128xf32>
    %cst = arith.constant dense<0.000000e+00> : vector<8x128xf32>
    %2 = tpu.matmul %0, %1, %cst {dimension_numbers = #tpu.dot_dimension_numbers<[1], [0], [0], [1], [0, 0, 1, 1], [], []>, precision = #tpu.contract_precision<fp32>} : vector<8x32xf32>, vector<32x128xf32>, vector<8x128xf32> -> vector<8x128xf32>
    %cst_3 = arith.constant 0.000000e+00 : f32
    %3 = vector.broadcast %cst_3 : f32 to vector<8x128xf32>
    %4 = arith.maximumf %2, %3 : vector<8x128xf32>
    %c0_4 = arith.constant 0 : index
    %c0_5 = arith.constant 0 : index
    %5 = vector.load %arg4[%c0_4, %c0_5] : memref<128x128xf32, #tpu.memory_space<vmem>>, vector<128x128xf32>
    %cst_6 = arith.constant dense<0.000000e+00> : vector<8x128xf32>
    %6 = tpu.matmul %4, %5, %cst_6 {dimension_numbers = #tpu.dot_dimension_numbers<[1], [0], [0], [1], [0, 0, 1, 1], [], []>, precision = #tpu.contract_precision<fp32>} : vector<8x128xf32>, vector<128x128xf32>, vector<8x128xf32> -> vector<8x128xf32>
    %cst_7 = arith.constant 0.000000e+00 : f32
    %7 = vector.broadcast %cst_7 : f32 to vector<8x128xf32>
    %8 = arith.maximumf %6, %7 : vector<8x128xf32>
    %c0_8 = arith.constant 0 : index
    %c0_9 = arith.constant 0 : index
    %9 = vector.load %arg5[%c0_8, %c0_9] : memref<8x128xf32, #tpu.memory_space<vmem>>, vector<8x128xf32>
    tpu.vector_store %arg5[%c0_8, %c0_9], %8 {strides = array<i32>} : memref<8x128xf32, #tpu.memory_space<vmem>>, vector<8x128xf32>,
    return
  }
  func.func @transform_0(%arg0: i32, %arg1: i32) -> (i32, i32) {
    %c0_i32 = arith.constant 0 : i32
    %c0_i32_0 = arith.constant 0 : i32
    return %arg0, %c0_i32 : i32, i32
  }
  func.func @transform_1(%arg0: i32, %arg1: i32) -> (i32, i32) {
    %c0_i32 = arith.constant 0 : i32
    %c0_i32_0 = arith.constant 0 : i32
    %c0_i32_1 = arith.constant 0 : i32
    return %c0_i32, %c0_i32_0 : i32, i32
  }
  func.func @transform_2(%arg0: i32, %arg1: i32) -> (i32, i32) {
    %c0_i32 = arith.constant 0 : i32
    %c0_i32_0 = arith.constant 0 : i32
    return %c0_i32, %arg1 : i32, i32
  }
  func.func @transform_3(%arg0: i32, %arg1: i32) -> (i32, i32) {
    %c0_i32 = arith.constant 0 : i32
    return %arg0, %arg1 : i32, i32
  }
}

</mosaic_0001>

<bundles_post_ra>
// kernel: tpu_custom_call.1
= control target key start
LH: loop header
LB: loop body
LE: loop exit
PB: predicated region body
PF: predicated region fallthrough
CT: control target
= control target key end

     0   :  { %8 = vsyncpa [#allocation3], 0  ;;  %s2441_s0 = inlined_call_operand.hbm [shape: f32[8,32], index: 0, kind: input, shape index: {}]   ;;  %s2442_s1 = inlined_call_operand.hbm [shape: f32[32,128], index: 1, kind: input, shape index: {}]   ;;  %s2443_s2 = inlined_call_operand.hbm [shape: f32[128,128], index: 2, kind: input, shape index: {}]   ;;  %s2444_s3 = inlined_call_operand.hbm [shape: f32[8,128], index: 3, kind: output, shape index: {}]  }
   0x1   :  { %9 = vsyncpa [#allocation6], 0 }
   0x2   :  { %10 = vsyncpa [#allocation4], 0  ;;  %s1934_s12 = smov [#allocation5]   ;;  %s1840_s16 = scalar_lea.hbm %s2442_s1, 512 }
   0x3   :  { %s26_s13 = sshll.u32 %s1934_s12, 4  ;;  %p1841_p0 = scmp.ne.s32.totalorder %s2442_s1, %s1840_s16  ;;  %s27_s13 = int_to_ptr.vmem [resolvable:$true] %s26_s13 }
   0x4   :  { %p1844_p1 = scmp.lt.u32.totalorder %s1840_s16, %s2442_s1 }
   0x6   :  { %p1846_p2 = pnand %p1844_p1, %p1841_p0 }
   0x8   :  { %1849 = shalt.err (!%p1846_p2)
}
   0x9   :  { %s1850_s21 = scalar_lea.vmem %s27_s13, 512  ;;  %p1855_p4 = scmp.lt.s32.totalorder %s27_s13, %s27_s13 }
   0xa   :  { %p1851_p3 = scmp.ne.s32.totalorder %s27_s13, %s1850_s21  ;;  %p1856_p5 = scmp.lt.s32.totalorder %s1850_s21, %s1850_s21 }
   0xc   :  { %p1857_p6 = por %p1856_p5, %p1855_p4 }
   0xe   :  { %p1858_p7 = pnand %p1857_p6, %p1851_p3 }
  0x10   :  { %1861 = shalt.err (!%p1858_p7)
}
  0x11   :  { %s1935_s22 = smov 128   ;;  %s1936_s23 = smov 8  }
  0x12   :  { %32 = dma.hbm_to_vmem [thread:$0]  %s2442_s1, 512, %s27_s13, [#allocation6], %s1935_s22, %s1935_s22, %s1936_s23  }
  0x13   :  { %s1937_s26 = smov [#allocation2]   ;;  %s1938_s28 = smov [#allocation7]  }
  0x14   :  { %s17_s27 = sshll.u32 %s1937_s26, 4  ;;  %s38_s29 = sshll.u32 %s1938_s28, 4  ;;  %s18_s27 = int_to_ptr.vmem [resolvable:$true] %s17_s27  ;;  %s39_s29 = int_to_ptr.vmem [resolvable:$true] %s38_s29 }
  0x15   :  { %s1862_s5 = scalar_lea.hbm %s2441_s0, 128 }
  0x16   :  { %p1863_p8 = scmp.ne.s32.totalorder %s2441_s0, %s1862_s5  ;;  %p1866_p9 = scmp.lt.u32.totalorder %s1862_s5, %s2441_s0 }
  0x18   :  { %p1868_p10 = pnand %p1866_p9, %p1863_p8 }
  0x1a   :  { %1871 = shalt.err (!%p1868_p10)
}
  0x1b   :  { %s1872_s1 = scalar_lea.vmem %s18_s27, 128  ;;  %p1877_p12 = scmp.lt.s32.totalorder %s18_s27, %s18_s27 }
  0x1c   :  { %p1873_p11 = scmp.ne.s32.totalorder %s18_s27, %s1872_s1  ;;  %p1878_p13 = scmp.lt.s32.totalorder %s1872_s1, %s1872_s1 }
  0x1e   :  { %p1879_p0 = por %p1878_p13, %p1877_p12 }
  0x20   :  { %p1880_p1 = pnand %p1879_p0, %p1873_p11 }
  0x22   :  { %1883 = shalt.err (!%p1880_p1)
}
  0x23   :  { %20 = dma.hbm_to_vmem [thread:$0]  %s2441_s0, 128, %s18_s27, [#allocation3]  }
  0x24   :  { %s1884_s14 = scalar_lea.hbm %s2443_s2, 2048 }
  0x25   :  { %p1885_p2 = scmp.ne.s32.totalorder %s2443_s2, %s1884_s14  ;;  %p1888_p3 = scmp.lt.u32.totalorder %s1884_s14, %s2443_s2 }
  0x27   :  { %p1890_p4 = pnand %p1888_p3, %p1885_p2 }
  0x29   :  { %1893 = shalt.err (!%p1890_p4)
}
  0x2a   :  { %s1894_s19 = scalar_lea.vmem %s39_s29, 2048  ;;  %p1899_p6 = scmp.lt.s32.totalorder %s39_s29, %s39_s29 }
  0x2b   :  { %p1895_p5 = scmp.ne.s32.totalorder %s39_s29, %s1894_s19  ;;  %p1900_p7 = scmp.lt.s32.totalorder %s1894_s19, %s1894_s19 }
  0x2d   :  { %p1901_p8 = por %p1900_p7, %p1899_p6 }
  0x2f   :  { %p1902_p9 = pnand %p1901_p8, %p1895_p5 }
  0x31   :  { %1905 = shalt.err (!%p1902_p9)
}
  0x32   :  { %44 = dma.hbm_to_vmem [thread:$0]  %s2443_s2, 2048, %s39_s29, [#allocation6], %s1935_s22, %s1935_s22, %s1936_s23  }
  0x33   :  { %1928 = dma.done.wait [#allocation3], 128  }
  0x34   :  { %1929 = vsyncadd [#allocation3], 4294967168 }
  0x35   :  { %1930 = dma.done.wait [#allocation6], 2560  }
  0x36   :  { %1931 = vsyncadd [#allocation6], 4294964736  ;;  %v1939_v0 = vmov 0.0|0.0   ;;  %vm1940_vm0 = vmmov 0   ;;  %v1941_v1 = vmov 0.0   ;;  %vm59_vm1 = vcmask 261120  }
  0x37   :  { %1632 = vmatprep.subr.bf16.mxu0 %v1939_v0  ;;  %1364 = vmatprep.mubr.msk.f32.mxu0 %vm1940_vm0, %v1941_v1  ;;  %v55_v2 = vld [vmem:[#allocation5] sm:$0xff]  ;;  %v56_v3 = vld [vmem:[#allocation5 + $0x8] sm:$0xff]  ;;  %v57_v4 = vld [vmem:[#allocation5 + $0x10] sm:$0xff]  ;;  %s1942_s2 = smov [#allocation8]  }
  0x38   :  { %1716 = vmatprep.subr.bf16.mxu1 %v1939_v0  ;;  %1524 = vmatprep.mubr.msk.f32.mxu1 %vm1940_vm0, %v1941_v1  ;;  %v64_v5 = vand.u32 4294901760, %v55_v2  ;;  %v67_v6 = vand.u32 4294901760, %v56_v3  ;;  %v58_v7 = vld [vmem:[#allocation5 + $0x18] sm:$0xff]  ;;  %v70_v8 = vand.u32 4294901760, %v57_v4  ;;  %v2011_v10 = vld [vmem:[#allocation7] sm:$0xff]  ;;  %v2013_v13 = vld [vmem:[#allocation7 + $0x8] sm:$0xff] }
  0x39   :  { %v54_v9 = vld [vmem:[#allocation2] sm:$0xff]  ;;  %v73_v11 = vand.u32 4294901760, %v58_v7  ;;  %v566_v14 = vand.u32 4294901760, %v2011_v10  ;;  %v569_v25 = vand.u32 4294901760, %v2013_v13  ;;  %v2054_v32 = vld [vmem:[#allocation7 + $0x10] sm:$0xff]  ;;  %v2074_v42 = vld [vmem:[#allocation7 + $0x20] sm:$0xff] }
  0x3a   :  { %v61_v12 = vsel %vm59_vm1, %v54_v9, 0  ;;  %v2016_v15 = vpack.c.bf16 %v67_v6, %v64_v5  ;;  %v2018_v16 = vsub.f32 %v55_v2, %v64_v5  ;;  %v2020_v17 = vsub.f32 %v56_v3, %v67_v6  ;;  %v2056_v33 = vld [vmem:[#allocation7 + $0x18] sm:$0xff]  ;;  %v2076_v43 = vld [vmem:[#allocation7 + $0x28] sm:$0xff]  ;;  %v2078_v44 = vld [vmem:[#allocation7 + $0x30] sm:$0xff]  ;;  %s1214_s21 = sshll.u32 %s1942_s2, 4  ;;  %s1215_s21 = int_to_ptr.vmem [resolvable:$true] %s1214_s21 }
  0x3b   :  { %v2022_v18 = vsub.f32 %v57_v4, %v70_v8  ;;  %v2024_v19 = vpack.c.bf16 %v73_v11, %v70_v8  ;;  %v2026_v20 = vsub.f32 %v58_v7, %v73_v11  ;;  %v2028_v21 = vand.u32 4294901760, %v61_v12  ;;  %v2082_v49 = vld [vmem:[#allocation7 + $0x38] sm:$0xff]  ;;  %v2097_v56 = vld [vmem:[#allocation7 + $0x40] sm:$0xff]  ;;  %v2103_v59 = vld [vmem:[#allocation7 + $0x48] sm:$0xff]  ;;  %s1906_s22 = scalar_lea.vmem %s1215_s21, 128  ;;  %p1911_p11 = scmp.lt.s32.totalorder %s1215_s21, %s1215_s21 }
  0x3c   :  { %1634 = vmatpush3.bf16.msra.mxu0 %v2016_v15  ;;  %v145_v22 = vand.u32 4294901760, %v2018_v16  ;;  %v152_v23 = vand.u32 4294901760, %v2020_v17  ;;  %v2052_v31 = vsub.f32 %v2011_v10, %v566_v14  ;;  %v2066_v38 = vsub.f32 %v2013_v13, %v569_v25  ;;  %v2132_v6 = vld [vmem:[#allocation7 + $0x50] sm:$0xff]  ;;  %v2135_v7 = vld [vmem:[#allocation7 + $0x58] sm:$0xff]  ;;  %p1907_p10 = scmp.ne.s32.totalorder %s1215_s21, %s1906_s22  ;;  %p1912_p12 = scmp.lt.s32.totalorder %s1906_s22, %s1906_s22 }
  0x3d   :  { %v159_v24 = vand.u32 4294901760, %v2022_v18  ;;  %1635 = vmatprep.subr.bf16.mxu0 %v1939_v0  ;;  %v2037_v26 = vsub.f32 %v61_v12, %v2028_v21  ;;  %v166_v27 = vand.u32 4294901760, %v2026_v20  ;;  %v572_v40 = vand.u32 4294901760, %v2054_v32 }
  0x3e   :  { %v146_v28 = vsub.f32 %v2018_v16, %v145_v22  ;;  %v153_v29 = vsub.f32 %v2020_v17, %v152_v23  ;;  %v575_v41 = vand.u32 4294901760, %v2056_v33  ;;  %v1717_v48 = vpack.c.bf16 %v2066_v38, %v2052_v31  ;;  %p1913_p13 = por %p1912_p12, %p1911_p11 }
  0x3f   :  { %v160_v30 = vsub.f32 %v2022_v18, %v159_v24  ;;  %v134_v34 = vand.u32 4294901760, %v2037_v26  ;;  %v167_v35 = vsub.f32 %v2026_v20, %v166_v27  ;;  %v2087_v51 = vsub.f32 %v2054_v32, %v572_v40 }
  0x40   :  { %1637 = vmatpush3.bf16.msra.mxu0 %v2024_v19  ;;  %v147_v36 = vand.u32 4294901760, %v146_v28  ;;  %v154_v37 = vand.u32 4294901760, %v153_v29  ;;  %v2092_v52 = vsub.f32 %v2056_v33, %v575_v41  ;;  %1718 = vmatpush3.bf16.msra.mxu1 %v1717_v48  ;;  %v578_v53 = vand.u32 4294901760, %v2074_v42  ;;  %p1914_p0 = pnand %p1913_p13, %p1907_p10 }
  0x41   :  { %v135_v39 = vsub.f32 %v2037_v26, %v134_v34  ;;  %1638 = vmatprep.subr.bf16.mxu0 %v1939_v0  ;;  %v161_v46 = vand.u32 4294901760, %v160_v30  ;;  %v168_v47 = vand.u32 4294901760, %v167_v35  ;;  %v581_v54 = vand.u32 4294901760, %v2076_v43  ;;  %1719 = vmatprep.subr.bf16.mxu1 %v1939_v0  ;;  %v2156_v30 = vld [vmem:[#allocation7 + $0x60] sm:$0xff]  ;;  %v2158_v35 = vld [vmem:[#allocation7 + $0x68] sm:$0xff] }
  0x42   :  { %v1639_v45 = vpack.c.bf16 %v154_v37, %v147_v36  ;;  %v584_v55 = vand.u32 4294901760, %v2078_v44  ;;  %v1720_v57 = vpack.c.bf16 %v2092_v52, %v2087_v51  ;;  %v587_v58 = vand.u32 4294901760, %v2082_v49 }
  0x43   :  { %v136_v50 = vand.u32 4294901760, %v135_v39  ;;  %v1642_v60 = vpack.c.bf16 %v168_v47, %v161_v46  ;;  %v2110_v61 = vsub.f32 %v2074_v42, %v578_v53  ;;  %v2115_v62 = vsub.f32 %v2076_v43, %v581_v54 }
  0x44   :  { %v590_v63 = vand.u32 4294901760, %v2097_v56  ;;  %1721 = vmatpush3.bf16.msra.mxu1 %v1720_v57  ;;  %v2124_v3 = vsub.f32 %v2078_v44, %v584_v55  ;;  %v2129_v4 = vsub.f32 %v2082_v49, %v587_v58  ;;  %v593_v5 = vand.u32 4294901760, %v2103_v59 }
  0x45   :  { %1365 = vmatmul.mubr.f32.vlgmr.msra.gmra.mrb[0].mxu0 %v136_v50  ;;  %v1723_v2 = vpack.c.bf16 %v2115_v62, %v2110_v61  ;;  %1722 = vmatprep.subr.bf16.mxu1 %v1939_v0  ;;  %v1645_v8 = vpack.c.bf16 %v2020_v17, %v2018_v16  ;;  %v596_v9 = vand.u32 4294901760, %v2132_v6  ;;  %v599_v29 = vand.u32 4294901760, %v2135_v7  ;;  %v563_v17 = vld [vmem:[#allocation7 + $0x70] sm:$0xff] }
  0x46   :  { %1640 = vmatpush3.bf16.msra.mxu0 %v1639_v45  ;;  %1375 = vmatprep.mubr.msk.f32.mxu0 %vm1940_vm0, %v1941_v1  ;;  %v1726_v11 = vpack.c.bf16 %v2129_v4, %v2124_v3  ;;  %v2146_v12 = vsub.f32 %v2097_v56, %v590_v63  ;;  %v2151_v28 = vsub.f32 %v2103_v59, %v593_v5  ;;  %v602_v46 = vand.u32 4294901760, %v2156_v30 }
  0x47   :  { %1641 = vmatprep.subr.bf16.mxu0 %v1939_v0  ;;  %v1648_v36 = vpack.c.bf16 %v2026_v20, %v2022_v18  ;;  %v2168_v37 = vsub.f32 %v2132_v6, %v596_v9  ;;  %v2175_v45 = vsub.f32 %v2135_v7, %v599_v29  ;;  %v605_v47 = vand.u32 4294901760, %v2158_v35  ;;  %v564_v18 = vld [vmem:[#allocation7 + $0x78] sm:$0xff] }
  0x48   :  { %1724 = vmatpush3.bf16.msra.mxu1 %v1723_v2  ;;  %v1729_v39 = vpack.c.bf16 %v2151_v28, %v2146_v12  ;;  %v2186_v50 = vsub.f32 %v2156_v30, %v602_v46  ;;  %v1657_v2 = vpack.c.bf16 %v152_v23, %v145_v22  ;;  %v2227_v16 = vpack.c.bf16 %v569_v25, %v566_v14 }
  0x49   :  { %1725 = vmatprep.subr.bf16.mxu1 %v1939_v0  ;;  %v1732_v48 = vpack.c.bf16 %v2175_v45, %v2168_v37  ;;  %v2189_v57 = vsub.f32 %v2158_v35, %v605_v47  ;;  %v2246_v10 = vpack.c.bf16 %v581_v54, %v578_v53  ;;  %v2254_v13 = vpack.c.bf16 %v587_v58, %v584_v55 }
  0x4a   :  { %1643 = vmatpush3.bf16.msra.mxu0 %v1642_v60  ;;  %v2262_v14 = vpack.c.bf16 %v593_v5, %v590_v63  ;;  %v611_v20 = vand.u32 4294901760, %v564_v18  ;;  %v2277_v25 = vpack.c.bf16 %v605_v47, %v602_v46  ;;  %v659_v44 = vand.u32 4294901760, %v2052_v31 }
  0x4b   :  { %1644 = vmatprep.subr.bf16.mxu0 %v1939_v0  ;;  %v1735_v60 = vpack.c.bf16 %v2189_v57, %v2186_v50  ;;  %v666_v49 = vand.u32 4294901760, %v2066_v38  ;;  %v673_v59 = vand.u32 4294901760, %v2087_v51  ;;  %v680_v63 = vand.u32 4294901760, %v2092_v52 }
  0x4c   :  { %1727 = vmatpush3.bf16.msra.mxu1 %v1726_v11  ;;  %v763_v23 = vsub.f32 %v564_v18, %v611_v20  ;;  %v660_v56 = vsub.f32 %v2052_v31, %v659_v44  ;;  %v687_v30 = vand.u32 4294901760, %v2110_v61  ;;  %v694_v35 = vand.u32 4294901760, %v2115_v62 }
  0x4d   :  { %1376 = vmatmul.mubr.f32.vlgmr.msra.gmra.mrb[0].mxu0 %v2028_v21  ;;  %1728 = vmatprep.subr.bf16.mxu1 %v1939_v0  ;;  %v667_v58 = vsub.f32 %v2066_v38, %v666_v49  ;;  %v674_v11 = vsub.f32 %v2087_v51, %v673_v59  ;;  %v701_v47 = vand.u32 4294901760, %v2124_v3 }
  0x4e   :  { %1646 = vmatpush3.bf16.msra.mxu0 %v1645_v8  ;;  %1386 = vmatprep.mubr.msk.f32.mxu0 %vm1940_vm0, %v1941_v1  ;;  %v1660_v8 = vpack.c.bf16 %v166_v27, %v159_v24  ;;  %v764_v32 = vand.u32 4294901760, %v763_v23  ;;  %v661_v7 = vand.u32 4294901760, %v660_v56  ;;  %v1771_v31 = vpack.c.bf16 %v694_v35, %v687_v30 }
  0x4f   :  { %1647 = vmatprep.subr.bf16.mxu0 %v1939_v0 }
  0x50   :  { %1730 = vmatpush3.bf16.msra.mxu1 %v1729_v39 }
  0x51   :  { %1731 = vmatprep.subr.bf16.mxu1 %v1939_v0 }
  0x52   :  { %1649 = vmatpush3.bf16.msra.mxu0 %v1648_v36 }
  0x53   :  { %1650 = vmatprep.subr.bf16.mxu0 %v1939_v0 }
  0x54   :  { %1733 = vmatpush3.bf16.msra.mxu1 %v1732_v48  ;;  %v708_v48 = vand.u32 4294901760, %v2129_v4 }
  0x55   :  { %1387 = vmatmul.mubr.f32.vlgmr.msra.gmra.mrb[0].mxu0 %v2037_v26  ;;  %1734 = vmatprep.subr.bf16.mxu1 %v1939_v0 }
  0x56   :  { %1652 = vmatpush3.bf16.msra.mxu0 %v2016_v15  ;;  %1397 = vmatprep.mubr.msk.f32.mxu0 %vm1940_vm0, %v1941_v1  ;;  %v1774_v38 = vpack.c.bf16 %v708_v48, %v701_v47 }
  0x57   :  { %1653 = vmatprep.subr.bf16.mxu0 %v1939_v0 }
  0x58   :  { %1736 = vmatpush3.bf16.msra.mxu1 %v1735_v60  ;;  %v675_v60 = vand.u32 4294901760, %v674_v11 }
  0x59   :  { %1737 = vmatprep.subr.bf16.mxu1 %v1939_v0 }
  0x5a   :  { %1655 = vmatpush3.bf16.msra.mxu0 %v2024_v19 }
  0x5b   :  { %1656 = vmatprep.subr.bf16.mxu0 %v1939_v0 }
  0x5d   :  { %1398 = vmatmul.mubr.f32.vlgmr.msra.gmra.mrb[0].mxu0 %v134_v34  ;;  %v765_v34 = vsub.f32 %v763_v23, %v764_v32 }
  0x5e   :  { %1658 = vmatpush3.bf16.msra.mxu0 %v1657_v2  ;;  %1408 = vmatprep.mubr.msk.f32.mxu0 %vm1940_vm0, %v1941_v1 }
  0x5f   :  { %1659 = vmatprep.subr.bf16.mxu0 %v1939_v0 }
  0x62   :  { %1661 = vmatpush3.bf16.msra.mxu0 %v1660_v8  ;;  %v688_v8 = vsub.f32 %v2110_v61, %v687_v30 }
  0x63   :  { %1662 = vmatprep.subr.bf16.mxu0 %v1939_v0 }
  0x65   :  { %1409 = vmatmul.mubr.f32.vlgmr.msra.gmra.mrb[0].mxu0 %v2028_v21 }
  0x66   :  { %1664 = vmatpush3.bf16.msra.mxu0 %v2016_v15  ;;  %1419 = vmatprep.mubr.msk.f32.mxu0 %vm1940_vm0, %v1941_v1  ;;  %v2236_v15 = vpack.c.bf16 %v575_v41, %v572_v40  ;;  %v766_v41 = vand.u32 4294901760, %v765_v34 }
  0x67   :  { %1665 = vmatprep.subr.bf16.mxu0 %v1939_v0 }
  0x6a   :  { %1667 = vmatpush3.bf16.msra.mxu0 %v2024_v19  ;;  %v608_v19 = vand.u32 4294901760, %v563_v17 }
  0x6b   :  { %1668 = vmatprep.subr.bf16.mxu0 %v1939_v0 }
  0x6c   :  { %v756_v22 = vsub.f32 %v563_v17, %v608_v19  ;;  %v2282_v26 = vpack.c.bf16 %v611_v20, %v608_v19  ;;  %v695_v17 = vsub.f32 %v2115_v62, %v694_v35  ;;  %v702_v19 = vsub.f32 %v2124_v3, %v701_v47 }
  0x6d   :  { %1420 = vmatmul.mubr.f32.vlgmr.msra.gmra.mrb[0].mxu0 %v2028_v21  ;;  %v2271_v21 = vpack.c.bf16 %v599_v29, %v596_v9  ;;  %v668_v9 = vand.u32 4294901760, %v667_v58  ;;  %v681_v29 = vsub.f32 %v2092_v52, %v680_v63  ;;  %v709_v20 = vsub.f32 %v2129_v4, %v708_v48 }
  0x6e   :  { %1670 = vmatpush3.bf16.msra.mxu0 %v2227_v16  ;;  %1454 = vmatprep.mubr.msk.f32.mxu0 %vm1940_vm0, %v1941_v1  ;;  %v1738_v24 = vpack.c.bf16 %v763_v23, %v756_v22  ;;  %v757_v27 = vand.u32 4294901760, %v756_v22  ;;  %v722_v23 = vand.u32 4294901760, %v2151_v28 }
  0x6f   :  { %1671 = vmatprep.subr.bf16.mxu0 %v1939_v0  ;;  %v1693_v46 = vpack.c.bf16 %v668_v9, %v661_v7  ;;  %v682_v2 = vand.u32 4294901760, %v681_v29  ;;  %v710_v34 = vand.u32 4294901760, %v709_v20  ;;  %v743_v29 = vand.u32 4294901760, %v2186_v50 }
  0x70   :  { %1739 = vmatpush3.bf16.msra.mxu1 %v1738_v24  ;;  %v758_v33 = vsub.f32 %v756_v22, %v757_v27  ;;  %v2288_v43 = vpack.c.bf16 %v764_v32, %v757_v27  ;;  %v715_v22 = vand.u32 4294901760, %v2146_v12  ;;  %v689_v27 = vand.u32 4294901760, %v688_v8 }
  0x71   :  { %1740 = vmatprep.subr.bf16.mxu1 %v1939_v0  ;;  %v1696_v24 = vpack.c.bf16 %v682_v2, %v675_v60  ;;  %v696_v32 = vand.u32 4294901760, %v695_v17  ;;  %v744_v8 = vsub.f32 %v2186_v50, %v743_v29 }
  0x72   :  { %1673 = vmatpush3.bf16.msra.mxu0 %v2236_v15  ;;  %v759_v40 = vand.u32 4294901760, %v758_v33  ;;  %v703_v33 = vand.u32 4294901760, %v702_v19  ;;  %v1768_v19 = vpack.c.bf16 %v680_v63, %v673_v59  ;;  %v1777_v51 = vpack.c.bf16 %v722_v23, %v715_v22 }
  0x73   :  { %1674 = vmatprep.subr.bf16.mxu0 %v1939_v0  ;;  %v745_v17 = vand.u32 4294901760, %v744_v8 }
  0x74   :  { %v2286_v42 = vpack.c.bf16 %v766_v41, %v759_v40  ;;  %v716_v40 = vsub.f32 %v2146_v12, %v715_v22  ;;  %v723_v41 = vsub.f32 %v2151_v28, %v722_v23  ;;  %v1702_v56 = vpack.c.bf16 %v710_v34, %v703_v33 }
  0x76   :  { %1676 = vmatpush3.bf16.msra.mxu0 %v2246_v10  ;;  %v717_v58 = vand.u32 4294901760, %v716_v40  ;;  %v724_v7 = vand.u32 4294901760, %v723_v41 }
  0x77   :  { %1677 = vmatprep.subr.bf16.mxu0 %v1939_v0 }
  0x7a   :  { %1679 = vmatpush3.bf16.msra.mxu0 %v2254_v13 }
  0x7b   :  { %1680 = vmatprep.subr.bf16.mxu0 %v1939_v0 }
  0x7e   :  { %1682 = vmatpush3.bf16.msra.mxu0 %v2262_v14 }
  0x7f   :  { %1683 = vmatprep.subr.bf16.mxu0 %v1939_v0 }
  0x82   :  { %1685 = vmatpush3.bf16.msra.mxu0 %v2271_v21 }
  0x83   :  { %1686 = vmatprep.subr.bf16.mxu0 %v1939_v0 }
  0x86   :  { %1688 = vmatpush3.bf16.msra.mxu0 %v2277_v25 }
  0x87   :  { %1689 = vmatprep.subr.bf16.mxu0 %v1939_v0 }
  0x8a   :  { %1691 = vmatpush3.bf16.msra.mxu0 %v2282_v26 }
  0x8b   :  { %1692 = vmatprep.subr.bf16.mxu0 %v1939_v0 }
 0x140   :  { %v544_v53 = vpop.f32.mrb[0].mxu0 }
 0x141   :  { %v548_v54 = vmax.f32 %v544_v53, 0.0  ;;  %v1421_v55 = vpop.f32.mrb[1].mxu0  ;;  %v1699_v53 = vpack.c.bf16 %v696_v32, %v689_v27 }
 0x142   :  { %v736_v55 = vand.u32 4294901760, %v2175_v45 }
 0x143   :  { %v2300_v5 = vand.u32 4294901760, %v548_v54 }
 0x144   :  { %v737_v11 = vsub.f32 %v2175_v45, %v736_v55 }
 0x145   :  { %v2303_v6 = vsub.f32 %v548_v54, %v2300_v5  ;;  %v729_v54 = vand.u32 4294901760, %v2168_v37 }
 0x146   :  { %v738_v2 = vand.u32 4294901760, %v737_v11 }
 0x147   :  { %v648_v36 = vand.u32 4294901760, %v2303_v6  ;;  %1525 = vmatmul.mubr.f32.vlgmr.msra.gmra.mrb[0].mxu1 %v2303_v6  ;;  %v730_v9 = vsub.f32 %v2168_v37, %v729_v54  ;;  %v1780_v52 = vpack.c.bf16 %v736_v55, %v729_v54 }
 0x148   :  { %1742 = vmatpush3.bf16.msra.mxu1 %v2227_v16  ;;  %1559 = vmatprep.mubr.msk.f32.mxu1 %vm1940_vm0, %v1941_v1 }
 0x149   :  { %v649_v39 = vsub.f32 %v2303_v6, %v648_v36  ;;  %1743 = vmatprep.subr.bf16.mxu1 %v1939_v0  ;;  %v731_v60 = vand.u32 4294901760, %v730_v9 }
 0x14b   :  { %v650_v18 = vand.u32 4294901760, %v649_v39  ;;  %v750_v39 = vand.u32 4294901760, %v2189_v57  ;;  %v1708_v45 = vpack.c.bf16 %v738_v2, %v731_v60 }
 0x14c   :  { %1745 = vmatpush3.bf16.msra.mxu1 %v2236_v15 }
 0x14d   :  { %1455 = vmatmul.mubr.f32.vlgmr.msra.gmra.mrb[2].mxu0 %v650_v18  ;;  %1746 = vmatprep.subr.bf16.mxu1 %v1939_v0  ;;  %v751_v37 = vsub.f32 %v2189_v57, %v750_v39  ;;  %v1765_v57 = vpack.c.bf16 %v666_v49, %v659_v44  ;;  %v1783_v61 = vpack.c.bf16 %v750_v39, %v743_v29 }
 0x14e   :  { %1694 = vmatpush3.bf16.msra.mxu0 %v1693_v46  ;;  %1489 = vmatprep.mubr.msk.f32.mxu0 %vm1940_vm0, %v1941_v1  ;;  %v1705_v46 = vpack.c.bf16 %v724_v7, %v717_v58 }
 0x14f   :  { %1695 = vmatprep.subr.bf16.mxu0 %v1939_v0  ;;  %v752_v18 = vand.u32 4294901760, %v751_v37 }
 0x150   :  { %1748 = vmatpush3.bf16.msra.mxu1 %v2246_v10 }
 0x151   :  { %1749 = vmatprep.subr.bf16.mxu1 %v1939_v0  ;;  %v1711_v50 = vpack.c.bf16 %v752_v18, %v745_v17 }
 0x152   :  { %1697 = vmatpush3.bf16.msra.mxu0 %v1696_v24 }
 0x153   :  { %1698 = vmatprep.subr.bf16.mxu0 %v1939_v0 }
 0x154   :  { %1751 = vmatpush3.bf16.msra.mxu1 %v2254_v13 }
 0x155   :  { %1752 = vmatprep.subr.bf16.mxu1 %v1939_v0 }
 0x156   :  { %1700 = vmatpush3.bf16.msra.mxu0 %v1699_v53 }
 0x157   :  { %1701 = vmatprep.subr.bf16.mxu0 %v1939_v0 }
 0x158   :  { %1754 = vmatpush3.bf16.msra.mxu1 %v2262_v14 }
 0x159   :  { %1755 = vmatprep.subr.bf16.mxu1 %v1939_v0 }
 0x15a   :  { %1703 = vmatpush3.bf16.msra.mxu0 %v1702_v56 }
 0x15b   :  { %1704 = vmatprep.subr.bf16.mxu0 %v1939_v0 }
 0x15c   :  { %1757 = vmatpush3.bf16.msra.mxu1 %v2271_v21 }
 0x15d   :  { %1758 = vmatprep.subr.bf16.mxu1 %v1939_v0 }
 0x15e   :  { %1706 = vmatpush3.bf16.msra.mxu0 %v1705_v46 }
 0x15f   :  { %1707 = vmatprep.subr.bf16.mxu0 %v1939_v0 }
 0x160   :  { %1760 = vmatpush3.bf16.msra.mxu1 %v2277_v25 }
 0x161   :  { %1761 = vmatprep.subr.bf16.mxu1 %v1939_v0 }
 0x162   :  { %1709 = vmatpush3.bf16.msra.mxu0 %v1708_v45 }
 0x163   :  { %1710 = vmatprep.subr.bf16.mxu0 %v1939_v0 }
 0x164   :  { %1763 = vmatpush3.bf16.msra.mxu1 %v2282_v26 }
 0x165   :  { %1764 = vmatprep.subr.bf16.mxu1 %v1939_v0 }
 0x166   :  { %1712 = vmatpush3.bf16.msra.mxu0 %v1711_v50 }
 0x167   :  { %1560 = vmatmul.mubr.f32.vlgmr.msra.gmra.mrb[0].mxu1 %v648_v36  ;;  %1713 = vmatprep.subr.bf16.mxu0 %v1939_v0 }
 0x168   :  { %1766 = vmatpush3.bf16.msra.mxu1 %v1765_v57  ;;  %1594 = vmatprep.mubr.msk.f32.mxu1 %vm1940_vm0, %v1941_v1 }
 0x169   :  { %1767 = vmatprep.subr.bf16.mxu1 %v1939_v0 }
 0x16a   :  { %1715 = vmatpush3.bf16.msra.mxu0 %v2286_v42 }
 0x16c   :  { %1769 = vmatpush3.bf16.msra.mxu1 %v1768_v19 }
 0x16d   :  { %1490 = vmatmul.mubr.f32.vlgmr.msra.gmra.mrb[2].mxu0 %v2300_v5  ;;  %1770 = vmatprep.subr.bf16.mxu1 %v1939_v0 }
 0x170   :  { %1772 = vmatpush3.bf16.msra.mxu1 %v1771_v31 }
 0x171   :  { %1773 = vmatprep.subr.bf16.mxu1 %v1939_v0 }
 0x174   :  { %1775 = vmatpush3.bf16.msra.mxu1 %v1774_v38 }
 0x175   :  { %1776 = vmatprep.subr.bf16.mxu1 %v1939_v0 }
 0x178   :  { %1778 = vmatpush3.bf16.msra.mxu1 %v1777_v51 }
 0x179   :  { %1779 = vmatprep.subr.bf16.mxu1 %v1939_v0 }
 0x17c   :  { %1781 = vmatpush3.bf16.msra.mxu1 %v1780_v52 }
 0x17d   :  { %1782 = vmatprep.subr.bf16.mxu1 %v1939_v0 }
 0x180   :  { %1784 = vmatpush3.bf16.msra.mxu1 %v1783_v61 }
 0x181   :  { %1785 = vmatprep.subr.bf16.mxu1 %v1939_v0 }
 0x184   :  { %1787 = vmatpush3.bf16.msra.mxu1 %v2288_v43 }
 0x185   :  { %1788 = vmatprep.subr.bf16.mxu1 %v1939_v0 }
 0x187   :  { %1595 = vmatmul.mubr.f32.vlgmr.msra.gmra.mrb[0].mxu1 %v2300_v5 }
 0x188   :  { %1790 = vmatpush3.bf16.msra.mxu1 %v2227_v16  ;;  %1629 = vmatprep.mubr.msk.f32.mxu1 %vm1940_vm0, %v1941_v1 }
 0x189   :  { %1791 = vmatprep.subr.bf16.mxu1 %v1939_v0 }
 0x18c   :  { %1793 = vmatpush3.bf16.msra.mxu1 %v2236_v15 }
 0x18d   :  { %1794 = vmatprep.subr.bf16.mxu1 %v1939_v0 }
 0x190   :  { %1796 = vmatpush3.bf16.msra.mxu1 %v2246_v10 }
 0x191   :  { %1797 = vmatprep.subr.bf16.mxu1 %v1939_v0 }
 0x194   :  { %1799 = vmatpush3.bf16.msra.mxu1 %v2254_v13 }
 0x195   :  { %1800 = vmatprep.subr.bf16.mxu1 %v1939_v0 }
 0x198   :  { %1802 = vmatpush3.bf16.msra.mxu1 %v2262_v14 }
 0x199   :  { %1803 = vmatprep.subr.bf16.mxu1 %v1939_v0 }
 0x19c   :  { %1805 = vmatpush3.bf16.msra.mxu1 %v2271_v21 }
 0x19d   :  { %1806 = vmatprep.subr.bf16.mxu1 %v1939_v0 }
 0x1a0   :  { %1808 = vmatpush3.bf16.msra.mxu1 %v2277_v25 }
 0x1a1   :  { %1809 = vmatprep.subr.bf16.mxu1 %v1939_v0 }
 0x1a4   :  { %1811 = vmatpush3.bf16.msra.mxu1 %v2282_v26 }
 0x1a7   :  { %1630 = vmatmul.mubr.f32.vlgmr.msra.gmra.mrb[0].mxu1 %v2300_v5 }
 0x240   :  { %v803_v1 = vpop.f32.mrb[2].mxu0 }
 0x241   :  { %v1491_v62 = vpop.f32.mrb[3].mxu0 }
 0x27a   :  { %v1202_v3 = vpop.f32.mrb[0].mxu1 }
 0x27b   :  { %v1812_v4 = vadd.f32 %v1202_v3, %v803_v1  ;;  %v1631_v12 = vpop.f32.mrb[1].mxu1 }
 0x27d   :  { %v1206_v28 = vmax.f32 %v1812_v4, 0.0 }
 0x27f   :  { %1207 = vst [vmem:[#allocation8] sm:$0xff] %v1206_v28 }
 0x280   :  { %1917 = shalt.err (!%p1914_p0)
}
 0x281   :  { %s1918_s25 = scalar_lea.hbm %s2444_s3, 128 }
 0x282   :  { %p1919_p1 = scmp.ne.s32.totalorder %s2444_s3, %s1918_s25  ;;  %p1922_p2 = scmp.lt.u32.totalorder %s1918_s25, %s2444_s3 }
 0x284   :  { %p1924_p3 = pnand %p1922_p2, %p1919_p1 }
 0x286   :  { %1927 = shalt.err (!%p1924_p3)
}
 0x287   :  { %1217 = dma.vmem_to_hbm [thread:$0]  %s1215_s21, 128, %s2444_s3, [#allocation4]  }
 0x288   :  { %1932 = dma.done.wait [#allocation4], 128  }
 0x289   :  { %1933 = vsyncadd [#allocation4], 4294967168 }
 0x28a   :  { %1221 = vsyncpa [#allocation3], 1 }
 0x28b   :  { %1222 = vsyncpa [#allocation6], 1 }
 0x28c   :  { %1223 = vsyncpa [#allocation4], 1 }

</bundles_post_ra>
